<compile_context>
chip_gen: v7x
topology: tpu7x:2x2x1
jax: 0.10.0
libtpu: 0.0.40
codegen_flags: <defaults>
</compile_context>

<pallas_src>
import functools

import jax
import jax.numpy as jnp
import numpy as np
from jax.experimental import pallas as pl
from jax.experimental.pallas import tpu as pltpu


def conv_stats_kernel(x_ref, band_ref, y_ref, psum_ref, psq_ref, *, kh, h_out):
    # x_ref    : (1, Hp, Wp*Cin)         padded, flattened input image
    # band_ref : (kh, Wp*Cin, Wout*Cout) banded weights (see _banded_weights)
    # y_ref    : (1, Hout, Wout*Cout)    conv output, lane-dense layout
    # psum_ref : (1, 1, Wout*Cout)       per-image sum (for BN batch stats)
    # psq_ref  : (1, 1, Wout*Cout)       per-image sum of squares
    wc = band_ref.shape[-1]
    acc = jnp.zeros((h_out, wc), jnp.float32)
    for i in range(kh):  # kh is tiny (3): unrolled, no relayouts, one matmul per tap-row
        acc += jnp.dot(x_ref[0, i:i + h_out, :], band_ref[i],
                       preferred_element_type=jnp.float32)
    y_ref[...] = acc.reshape(1, h_out, wc).astype(y_ref.dtype)
    psum_ref[...] = jnp.sum(acc, axis=0).reshape(1, 1, wc)
    psq_ref[...] = jnp.sum(acc * acc, axis=0).reshape(1, 1, wc)


def bn_act_kernel(y_ref, scale_ref, shift_ref, o_ref, *, act):
    # z = y * scale + shift, then activation. All blocks lane-dense (last dim W*Cout).
    y = y_ref[...].astype(jnp.float32)      # (1, Hout, Wout*Cout)
    s = scale_ref[...][:, None, :]          # (1, 1, Wout*Cout)
    b = shift_ref[...][:, None, :]
    z = y * s + b
    if act == "relu":
        z = jnp.maximum(z, 0.0)
    elif act == "hard_swish":
        # nn.Hardswish: x * relu6(x + 3) / 6
        z = z * jnp.clip(z + 3.0, 0.0, 6.0) * (1.0 / 6.0)
    # act is None -> identity
    o_ref[...] = z.astype(o_ref.dtype)


def _banded_weights(weight_oihw, w_out, wp, dtype):
    """band[i, (w+j)*Cin + c, w*Cout + o] = weight[o, c, i, j]; zeros elsewhere."""
    cout, cin, kh, kw = weight_oihw.shape
    w_tap = jnp.transpose(weight_oihw, (2, 3, 1, 0))  # (kh, kw, Cin, Cout)
    wo = jnp.arange(w_out)
    jj = jnp.arange(kw)
    cc = jnp.arange(cin)
    oo = jnp.arange(cout)
    rows = (wo[:, None, None] + jj[None, :, None]) * cin + cc[None, None, :]  # (Wout, kw, Cin)
    cols = wo[:, None] * cout + oo[None, :]                                    # (Wout, Cout)
    bands = []
    for i in range(kh):
        vals = jnp.broadcast_to(w_tap[i][None], (w_out, kw, cin, cout))
        band_i = jnp.zeros((wp * cin, w_out * cout), jnp.float32)
        band_i = band_i.at[rows[:, :, :, None], cols[:, None, None, :]].set(vals)
        bands.append(band_i)
    return jnp.stack(bands, axis=0).astype(dtype)  # (kh, Wp*Cin, Wout*Cout)


def conv_bn_layer(x_nchw, weight_oihw, gamma, beta, *, stride, padding, act=None, eps=1e-5):
    """Forward pass of ConvBNLayer (groups=1, stride=1). Returns NCHW output."""
    assert stride == 1, "this kernel covers the stride=1 ESNet configs"
    # TODO(synk): groups > 1 (depthwise variants of ESNet) not implemented.
    n, cin, h, w = x_nchw.shape
    cout, cin_w, kh, kw = weight_oihw.shape
    assert cin_w == cin, "groups != 1 not supported"

    hp, wp = h + 2 * padding, w + 2 * padding
    h_out = hp - kh + 1
    w_out = wp - kw + 1
    wc = w_out * cout

    # NCHW -> padded, flattened NHWC: x_flat[n, h, w*Cin + c].
    # TODO(synk): for large feature maps, fold transpose/pad into the kernel and tile
    # spatially (H halo) so blocks stay within v7x's smaller VMEM.
    x_nhwc = jnp.transpose(x_nchw, (0, 2, 3, 1))
    x_pad = jnp.pad(x_nhwc, ((0, 0), (padding, padding), (padding, padding), (0, 0)))
    x_flat = x_pad.reshape(n, hp, wp * cin)

    band = _banded_weights(weight_oihw, w_out, wp, x_nchw.dtype)

    conv_fn = pl.pallas_call(
        functools.partial(conv_stats_kernel, kh=kh, h_out=h_out),
        out_shape=(
            jax.ShapeDtypeStruct((n, h_out, wc), x_nchw.dtype),   # conv output (input dtype)
            jax.ShapeDtypeStruct((n, 1, wc), jnp.float32),        # per-image sum
            jax.ShapeDtypeStruct((n, 1, wc), jnp.float32),        # per-image sum of squares
        ),
        grid_spec=pltpu.PrefetchScalarGridSpec(
            num_scalar_prefetch=0,
            grid=(n,),
            in_specs=[
                pl.BlockSpec((1, hp, wp * cin), lambda b: (b, 0, 0)),
                pl.BlockSpec((kh, wp * cin, wc), lambda b: (0, 0, 0)),
            ],
            out_specs=[
                pl.BlockSpec((1, h_out, wc), lambda b: (b, 0, 0)),
                pl.BlockSpec((1, 1, wc), lambda b: (b, 0, 0)),    # per-image partials,
                pl.BlockSpec((1, 1, wc), lambda b: (b, 0, 0)),    # no resident accumulator
            ],
        ),
        compiler_params=pltpu.CompilerParams(dimension_semantics=("parallel",)),
    )
    y_conv, psum, psq = conv_fn(x_flat, band)

    # BatchNorm2d in PyTorch-default training mode: biased batch stats over N, H, W.
    count = float(n * h_out * w_out)
    ch_sum = jnp.sum(psum.reshape(n, w_out, cout), axis=(0, 1))
    ch_sq = jnp.sum(psq.reshape(n, w_out, cout), axis=(0, 1))
    mean = ch_sum / count
    var = jnp.maximum(ch_sq / count - mean * mean, 0.0)
    invstd = jax.lax.rsqrt(var + eps)
    # Fold BN affine into two vectors: z = y*scale + shift.
    scale = invstd * gamma.astype(jnp.float32)
    shift = beta.astype(jnp.float32) - mean * scale
    # Tile per-channel vectors into the lane-dense (W*Cout) layout (index = w*Cout + o).
    scale_t = jnp.tile(scale, w_out).reshape(1, wc)
    shift_t = jnp.tile(shift, w_out).reshape(1, wc)

    bn_fn = pl.pallas_call(
        functools.partial(bn_act_kernel, act=act),
        out_shape=jax.ShapeDtypeStruct((n, h_out, wc), x_nchw.dtype),
        grid_spec=pltpu.PrefetchScalarGridSpec(
            num_scalar_prefetch=0,
            grid=(n,),
            in_specs=[
                pl.BlockSpec((1, h_out, wc), lambda b: (b, 0, 0)),
                pl.BlockSpec((1, wc), lambda b: (0, 0)),
                pl.BlockSpec((1, wc), lambda b: (0, 0)),
            ],
            out_specs=pl.BlockSpec((1, h_out, wc), lambda b: (b, 0, 0)),
        ),
        input_output_aliases={0: 0},  # write BN+act in place over the conv intermediate
        compiler_params=pltpu.CompilerParams(dimension_semantics=("parallel",)),
    )
    out_flat = bn_fn(y_conv, scale_t, shift_t)

    out_nhwc = out_flat.reshape(n, h_out, w_out, cout)
    return jnp.transpose(out_nhwc, (0, 3, 1, 2))  # back to NCHW


def _reference(x_nchw, weight_oihw, gamma, beta, *, stride, padding, act, eps=1e-5):
    y = jax.lax.conv_general_dilated(
        x_nchw, weight_oihw,
        window_strides=(stride, stride),
        padding=((padding, padding), (padding, padding)),
        dimension_numbers=("NCHW", "OIHW", "NCHW"),
    )
    mean = jnp.mean(y, axis=(0, 2, 3), keepdims=True)
    var = jnp.mean((y - mean) ** 2, axis=(0, 2, 3), keepdims=True)
    z = (y - mean) * jax.lax.rsqrt(var + eps) * gamma.reshape(1, -1, 1, 1) + beta.reshape(1, -1, 1, 1)
    if act == "relu":
        z = jnp.maximum(z, 0.0)
    elif act == "hard_swish":
        z = z * jnp.clip(z + 3.0, 0.0, 6.0) / 6.0
    return z


if __name__ == "__main__":
    # ConvBNLayer(in_channels=4, out_channels=8, kernel_size=3, stride=1, padding=1, act='hard_swish')
    N, CIN, H, W = 2, 4, 16, 16
    COUT, K, STRIDE, PAD = 8, 3, 1, 1
    ACT = "hard_swish"

    key = jax.random.PRNGKey(0)
    kx, kw_, kg, kb = jax.random.split(key, 4)
    x = jax.random.normal(kx, (N, CIN, H, W), dtype=jnp.float32)
    weight = jax.random.normal(kw_, (COUT, CIN, K, K), dtype=jnp.float32) * 0.1
    gamma = 1.0 + 0.1 * jax.random.normal(kg, (COUT,), dtype=jnp.float32)
    beta = 0.1 * jax.random.normal(kb, (COUT,), dtype=jnp.float32)

    fwd = jax.jit(functools.partial(conv_bn_layer, stride=STRIDE, padding=PAD, act=ACT))
    out = fwd(x, weight, gamma, beta)
    out = jax.block_until_ready(out)

    ref = _reference(x, weight, gamma, beta, stride=STRIDE, padding=PAD, act=ACT)
    np.testing.assert_allclose(np.asarray(out), np.asarray(ref), atol=1e-4, rtol=1e-4)

    print("KERNEL_OK")
</pallas_src>

<mosaic_0001>
module attributes {stable_mosaic.version = 11 : i64} {
  func.func @conv_stats_kernel(%arg0: i32, %arg1: memref<1x18x72xf32, #tpu.memory_space<vmem>>, %arg2: memref<3x72x128xf32, #tpu.memory_space<vmem>>, %arg3: memref<1x16x128xf32, #tpu.memory_space<vmem>>, %arg4: memref<1x1x128xf32, #tpu.memory_space<vmem>>, %arg5: memref<1x1x128xf32, #tpu.memory_space<vmem>>) attributes {dimension_semantics = [#tpu.dimension_semantics<parallel>], iteration_bounds = array<i64: 2>, scalar_prefetch = 0 : i64, scratch_operands = 0 : i64, tpu.core_type = #tpu.core_type<tc>, window_params = [{transform_indices = @transform_0, window_bounds = array<i64: 1, 18, 72>}, {pipeline_mode = #tpu.pipeline_mode<synchronous>, transform_indices = @transform_1, window_bounds = array<i64: 3, 72, 128>}, {transform_indices = @transform_2, window_bounds = array<i64: 1, 16, 128>}, {transform_indices = @transform_3, window_bounds = array<i64: 1, 1, 128>}, {transform_indices = @transform_4, window_bounds = array<i64: 1, 1, 128>}]} {
    %cst = arith.constant 0.000000e+00 : f32
    %0 = vector.broadcast %cst : f32 to vector<16x128xf32>
    %c0 = arith.constant 0 : index
    %c0_0 = arith.constant 0 : index
    %c0_1 = arith.constant 0 : index
    %1 = vector.load %arg1[%c0, %c0_0, %c0_1] : memref<1x18x72xf32, #tpu.memory_space<vmem>>, vector<1x16x72xf32>
    %2 = vector.shape_cast %1 : vector<1x16x72xf32> to vector<16x72xf32>
    %c0_2 = arith.constant 0 : index
    %c0_3 = arith.constant 0 : index
    %c0_4 = arith.constant 0 : index
    %3 = vector.load %arg2[%c0_2, %c0_3, %c0_4] : memref<3x72x128xf32, #tpu.memory_space<vmem>>, vector<1x72x128xf32>
    %4 = vector.shape_cast %3 : vector<1x72x128xf32> to vector<72x128xf32>
    %cst_5 = arith.constant dense<0.000000e+00> : vector<16x128xf32>
    %5 = tpu.matmul %2, %4, %cst_5 {dimension_numbers = #tpu.dot_dimension_numbers<[1], [0], [0], [1], [0, 0, 1, 1], [], []>} : vector<16x72xf32>, vector<72x128xf32>, vector<16x128xf32> -> vector<16x128xf32>
    %6 = arith.addf %0, %5 : vector<16x128xf32>
    %c0_6 = arith.constant 0 : index
    %c1 = arith.constant 1 : index
    %c0_7 = arith.constant 0 : index
    %7 = vector.load %arg1[%c0_6, %c1, %c0_7] : memref<1x18x72xf32, #tpu.memory_space<vmem>>, vector<1x16x72xf32>
    %8 = vector.shape_cast %7 : vector<1x16x72xf32> to vector<16x72xf32>
    %c1_8 = arith.constant 1 : index
    %c0_9 = arith.constant 0 : index
    %c0_10 = arith.constant 0 : index
    %9 = vector.load %arg2[%c1_8, %c0_9, %c0_10] : memref<3x72x128xf32, #tpu.memory_space<vmem>>, vector<1x72x128xf32>
    %10 = vector.shape_cast %9 : vector<1x72x128xf32> to vector<72x128xf32>
    %cst_11 = arith.constant dense<0.000000e+00> : vector<16x128xf32>
    %11 = tpu.matmul %8, %10, %cst_11 {dimension_numbers = #tpu.dot_dimension_numbers<[1], [0], [0], [1], [0, 0, 1, 1], [], []>} : vector<16x72xf32>, vector<72x128xf32>, vector<16x128xf32> -> vector<16x128xf32>
    %12 = arith.addf %6, %11 : vector<16x128xf32>
    %c0_12 = arith.constant 0 : index
    %c2 = arith.constant 2 : index
    %c0_13 = arith.constant 0 : index
    %13 = vector.load %arg1[%c0_12, %c2, %c0_13] : memref<1x18x72xf32, #tpu.memory_space<vmem>>, vector<1x16x72xf32>
    %14 = vector.shape_cast %13 : vector<1x16x72xf32> to vector<16x72xf32>
    %c2_14 = arith.constant 2 : index
    %c0_15 = arith.constant 0 : index
    %c0_16 = arith.constant 0 : index
    %15 = vector.load %arg2[%c2_14, %c0_15, %c0_16] : memref<3x72x128xf32, #tpu.memory_space<vmem>>, vector<1x72x128xf32>
    %16 = vector.shape_cast %15 : vector<1x72x128xf32> to vector<72x128xf32>
    %cst_17 = arith.constant dense<0.000000e+00> : vector<16x128xf32>
    %17 = tpu.matmul %14, %16, %cst_17 {dimension_numbers = #tpu.dot_dimension_numbers<[1], [0], [0], [1], [0, 0, 1, 1], [], []>} : vector<16x72xf32>, vector<72x128xf32>, vector<16x128xf32> -> vector<16x128xf32>
    %18 = arith.addf %12, %17 : vector<16x128xf32>
    %19 = vector.shape_cast %18 : vector<16x128xf32> to vector<1x16x128xf32>
    %c0_18 = arith.constant 0 : index
    %c0_19 = arith.constant 0 : index
    %c0_20 = arith.constant 0 : index
    %20 = vector.load %arg3[%c0_18, %c0_19, %c0_20] : memref<1x16x128xf32, #tpu.memory_space<vmem>>, vector<1x16x128xf32>
    tpu.vector_store %arg3[%c0_18, %c0_19, %c0_20], %19 {strides = array<i32>} : memref<1x16x128xf32, #tpu.memory_space<vmem>>, vector<1x16x128xf32>,
    %cst_21 = arith.constant dense<0.000000e+00> : vector<128xf32>
    %21 = vector.multi_reduction <add>, %18, %cst_21 [0] : vector<16x128xf32> to vector<128xf32>
    %22 = vector.shape_cast %21 : vector<128xf32> to vector<1x1x128xf32>
    %c0_22 = arith.constant 0 : index
    %c0_23 = arith.constant 0 : index
    %c0_24 = arith.constant 0 : index
    %23 = vector.load %arg4[%c0_22, %c0_23, %c0_24] : memref<1x1x128xf32, #tpu.memory_space<vmem>>, vector<1x1x128xf32>
    tpu.vector_store %arg4[%c0_22, %c0_23, %c0_24], %22 {strides = array<i32>} : memref<1x1x128xf32, #tpu.memory_space<vmem>>, vector<1x1x128xf32>,
    %24 = arith.mulf %18, %18 : vector<16x128xf32>
    %cst_25 = arith.constant dense<0.000000e+00> : vector<128xf32>
    %25 = vector.multi_reduction <add>, %24, %cst_25 [0] : vector<16x128xf32> to vector<128xf32>
    %26 = vector.shape_cast %25 : vector<128xf32> to vector<1x1x128xf32>
    %c0_26 = arith.constant 0 : index
    %c0_27 = arith.constant 0 : index
    %c0_28 = arith.constant 0 : index
    %27 = vector.load %arg5[%c0_26, %c0_27, %c0_28] : memref<1x1x128xf32, #tpu.memory_space<vmem>>, vector<1x1x128xf32>
    tpu.vector_store %arg5[%c0_26, %c0_27, %c0_28], %26 {strides = array<i32>} : memref<1x1x128xf32, #tpu.memory_space<vmem>>, vector<1x1x128xf32>,
    return
  }
  func.func @transform_0(%arg0: i32) -> (i32, i32, i32) {
    %c0_i32 = arith.constant 0 : i32
    %c0_i32_0 = arith.constant 0 : i32
    %c0_i32_1 = arith.constant 0 : i32
    return %arg0, %c0_i32, %c0_i32_0 : i32, i32, i32
  }
  func.func @transform_1(%arg0: i32) -> (i32, i32, i32) {
    %c0_i32 = arith.constant 0 : i32
    %c0_i32_0 = arith.constant 0 : i32
    %c0_i32_1 = arith.constant 0 : i32
    %c0_i32_2 = arith.constant 0 : i32
    return %c0_i32, %c0_i32_0, %c0_i32_1 : i32, i32, i32
  }
  func.func @transform_2(%arg0: i32) -> (i32, i32, i32) {
    %c0_i32 = arith.constant 0 : i32
    %c0_i32_0 = arith.constant 0 : i32
    %c0_i32_1 = arith.constant 0 : i32
    return %arg0, %c0_i32, %c0_i32_0 : i32, i32, i32
  }
  func.func @transform_3(%arg0: i32) -> (i32, i32, i32) {
    %c0_i32 = arith.constant 0 : i32
    %c0_i32_0 = arith.constant 0 : i32
    %c0_i32_1 = arith.constant 0 : i32
    return %arg0, %c0_i32, %c0_i32_0 : i32, i32, i32
  }
  func.func @transform_4(%arg0: i32) -> (i32, i32, i32) {
    %c0_i32 = arith.constant 0 : i32
    %c0_i32_0 = arith.constant 0 : i32
    %c0_i32_1 = arith.constant 0 : i32
    return %arg0, %c0_i32, %c0_i32_0 : i32, i32, i32
  }
}

module attributes {stable_mosaic.version = 11 : i64} {
  func.func @bn_act_kernel(%arg0: i32, %arg1: memref<1x16x128xf32, #tpu.memory_space<vmem>>, %arg2: memref<1x128xf32, #tpu.memory_space<vmem>>, %arg3: memref<1x128xf32, #tpu.memory_space<vmem>>, %arg4: memref<1x16x128xf32, #tpu.memory_space<vmem>>) attributes {dimension_semantics = [#tpu.dimension_semantics<parallel>], iteration_bounds = array<i64: 2>, scalar_prefetch = 0 : i64, scratch_operands = 0 : i64, tpu.core_type = #tpu.core_type<tc>, window_params = [{transform_indices = @transform_0, window_bounds = array<i64: 1, 16, 128>}, {pipeline_mode = #tpu.pipeline_mode<synchronous>, transform_indices = @transform_1, window_bounds = array<i64: 1, 128>}, {pipeline_mode = #tpu.pipeline_mode<synchronous>, transform_indices = @transform_2, window_bounds = array<i64: 1, 128>}, {transform_indices = @transform_3, window_bounds = array<i64: 1, 16, 128>}]} {
    %c0 = arith.constant 0 : index
    %c0_0 = arith.constant 0 : index
    %c0_1 = arith.constant 0 : index
    %0 = vector.load %arg1[%c0, %c0_0, %c0_1] : memref<1x16x128xf32, #tpu.memory_space<vmem>>, vector<1x16x128xf32>
    %c0_2 = arith.constant 0 : index
    %c0_3 = arith.constant 0 : index
    %1 = vector.load %arg2[%c0_2, %c0_3] : memref<1x128xf32, #tpu.memory_space<vmem>>, vector<1x128xf32>
    %2 = vector.shape_cast %1 : vector<1x128xf32> to vector<1x1x128xf32>
    %c0_4 = arith.constant 0 : index
    %c0_5 = arith.constant 0 : index
    %3 = vector.load %arg3[%c0_4, %c0_5] : memref<1x128xf32, #tpu.memory_space<vmem>>, vector<1x128xf32>
    %4 = vector.shape_cast %3 : vector<1x128xf32> to vector<1x1x128xf32>
    %5 = vector.broadcast %2 : vector<1x1x128xf32> to vector<1x16x128xf32>
    %6 = arith.mulf %0, %5 : vector<1x16x128xf32>
    %7 = vector.broadcast %4 : vector<1x1x128xf32> to vector<1x16x128xf32>
    %8 = arith.addf %6, %7 : vector<1x16x128xf32>
    %cst = arith.constant 3.000000e+00 : f32
    %9 = vector.broadcast %cst : f32 to vector<1x16x128xf32>
    %10 = arith.addf %8, %9 : vector<1x16x128xf32>
    %cst_6 = arith.constant 0.000000e+00 : f32
    %cst_7 = arith.constant 6.000000e+00 : f32
    %11 = vector.broadcast %cst_6 : f32 to vector<1x16x128xf32>
    %12 = arith.maximumf %11, %10 : vector<1x16x128xf32>
    %13 = vector.broadcast %cst_7 : f32 to vector<1x16x128xf32>
    %14 = arith.minimumf %13, %12 : vector<1x16x128xf32>
    %15 = arith.mulf %8, %14 : vector<1x16x128xf32>
    %cst_8 = arith.constant 0.166666672 : f32
    %16 = vector.broadcast %cst_8 : f32 to vector<1x16x128xf32>
    %17 = arith.mulf %15, %16 : vector<1x16x128xf32>
    %c0_9 = arith.constant 0 : index
    %c0_10 = arith.constant 0 : index
    %c0_11 = arith.constant 0 : index
    %18 = vector.load %arg4[%c0_9, %c0_10, %c0_11] : memref<1x16x128xf32, #tpu.memory_space<vmem>>, vector<1x16x128xf32>
    tpu.vector_store %arg4[%c0_9, %c0_10, %c0_11], %17 {strides = array<i32>} : memref<1x16x128xf32, #tpu.memory_space<vmem>>, vector<1x16x128xf32>,
    return
  }
  func.func @transform_0(%arg0: i32) -> (i32, i32, i32) {
    %c0_i32 = arith.constant 0 : i32
    %c0_i32_0 = arith.constant 0 : i32
    %c0_i32_1 = arith.constant 0 : i32
    return %arg0, %c0_i32, %c0_i32_0 : i32, i32, i32
  }
  func.func @transform_1(%arg0: i32) -> (i32, i32) {
    %c0_i32 = arith.constant 0 : i32
    %c0_i32_0 = arith.constant 0 : i32
    %c0_i32_1 = arith.constant 0 : i32
    return %c0_i32, %c0_i32_0 : i32, i32
  }
  func.func @transform_2(%arg0: i32) -> (i32, i32) {
    %c0_i32 = arith.constant 0 : i32
    %c0_i32_0 = arith.constant 0 : i32
    %c0_i32_1 = arith.constant 0 : i32
    return %c0_i32, %c0_i32_0 : i32, i32
  }
  func.func @transform_3(%arg0: i32) -> (i32, i32, i32) {
    %c0_i32 = arith.constant 0 : i32
    %c0_i32_0 = arith.constant 0 : i32
    %c0_i32_1 = arith.constant 0 : i32
    return %arg0, %c0_i32, %c0_i32_0 : i32, i32, i32
  }
}

</mosaic_0001>

<bundles_post_ra>
// kernel: tile.18
= control target key start
LH: loop header
LB: loop body
LE: loop exit
PB: predicated region body
PF: predicated region fallthrough
CT: control target
= control target key end

     0   :  { %s28_s0 = inlined_call_operand.vmem [shape: f32[8], index: 0, kind: input, shape index: {}]   ;;  %s29_s1 = inlined_call_operand.vmem [shape: f32[16,8], index: 1, kind: output, shape index: {}]  }
   0x1   :  { %v4_v0 = vld [vmem:[%s28_s0] ss:$0 sm:$0xff] }
   0x2   :  { %5 = vst [vmem:[%s29_s1] sm:$0xff] %v4_v0  ;;  %8 = vst [vmem:[%s29_s1 + $0x8] sm:$0xff] %v4_v0 }

// kernel: tile.19
= control target key start
LH: loop header
LB: loop body
LE: loop exit
PB: predicated region body
PF: predicated region fallthrough
CT: control target
= control target key end

     0   :  { %s131_s10 = smov 120   ;;  %s132_s11 = smov 104   ;;  %vm3_vm0 = vcmask 64512   ;;  %vm9_vm1 = vcmask 1048512   ;;  %vm15_vm2 = vcmask 982912   ;;  %vm21_vm3 = vcmask 917312   ;;  %s207_s0 = inlined_call_operand.vmem [shape: f32[16,8], index: 0, kind: input, shape index: {}]   ;;  %s208_s1 = inlined_call_operand.vmem [shape: f32[1,128], index: 1, kind: output, shape index: {}]  }
   0x1   :  { %v101_v0 = vld [vmem:[%s207_s0 + $0xf] sm:$0x1]   ;;  %v103_v1 = vld [vmem:[%s207_s0 + $0xd] sm:$0x1]   ;;  %v102_v2 = vld [vmem:[%s207_s0 + $0xe] sm:$0x1]  }
   0x2   :  { %7 = vrot.lane.b32.xlu0 %v101_v0, %s131_s10  ;;  %19 = vrot.lane.b32.xlu1 %v103_v1, %s132_s11  ;;  %v104_v3 = vld [vmem:[%s207_s0 + $0xc] sm:$0x1]   ;;  %s133_s16 = smov 112   ;;  %s134_s17 = smov 96   ;;  %v105_v4 = vld [vmem:[%s207_s0 + $0xb] sm:$0x1]  }
   0x3   :  { %v106_v5 = vld [vmem:[%s207_s0 + $0xa] sm:$0x1]   ;;  %v2_v6 = vld [vmem:[%s207_s0] sm:$0x1]   ;;  %s135_s24 = smov 88   ;;  %s136_s25 = smov 80  }
   0x4   :  { %4 = vst.msk [vmem:[#allocation0] sm:$0x1] %vm3_vm0, %v2_v6   ;;  %v107_v7 = vld [vmem:[%s207_s0 + $0x9] sm:$0x1]   ;;  %v108_v8 = vld [vmem:[%s207_s0 + $0x8] sm:$0x1]  }
   0x5   :  { %s137_s30 = smov 72   ;;  %s138_s2 = smov 64   ;;  %v109_v9 = vld [vmem:[%s207_s0 + $0x7] sm:$0x1]   ;;  %v110_v10 = vld [vmem:[%s207_s0 + $0x6] sm:$0x1]  }
   0x6   :  { %13 = vrot.lane.b32.xlu0 %v102_v2, %s133_s16  ;;  %25 = vrot.lane.b32.xlu1 %v104_v3, %s134_s17  ;;  %s139_s7 = smov 56   ;;  %s140_s8 = smov 48   ;;  %v111_v11 = vld [vmem:[%s207_s0 + $0x5] sm:$0x1]   ;;  %v112_v12 = vld [vmem:[%s207_s0 + $0x4] sm:$0x1]  }
   0x7   :  { %s141_s13 = smov 40   ;;  %s142_s14 = smov 32   ;;  %v113_v13 = vld [vmem:[%s207_s0 + $0x3] sm:$0x1]   ;;  %v114_v14 = vld [vmem:[%s207_s0 + $0x2] sm:$0x1]  }
   0x8   :  { %s143_s19 = smov 24   ;;  %s144_s20 = smov 16   ;;  %v115_v15 = vld [vmem:[%s207_s0 + $0x1] sm:$0x1]   ;;  %vm27_vm4 = vcmask 851712   ;;  %vm33_vm5 = vcmask 786112  }
   0x9   :  { %s145_s0 = smov 8   ;;  %vm39_vm6 = vcmask 720512   ;;  %vm45_vm7 = vcmask 654912   ;;  %vm51_vm8 = vcmask 589312   ;;  %vm57_vm9 = vcmask 523712  }
   0xa   :  { %31 = vrot.lane.b32.xlu0 %v105_v4, %s135_s24  ;;  %37 = vrot.lane.b32.xlu1 %v106_v5, %s136_s25  ;;  %vm63_vm10 = vcmask 458112   ;;  %vm69_vm11 = vcmask 392512   ;;  %vm75_vm12 = vcmask 326912   ;;  %vm81_vm13 = vcmask 261312  }
   0xb   :  { %vm87_vm14 = vcmask 195712   ;;  %vm93_vm15 = vcmask 130112  }
   0xe   :  { %43 = vrot.lane.b32.xlu0 %v107_v7, %s137_s30  ;;  %49 = vrot.lane.b32.xlu1 %v108_v8, %s138_s2 }
  0x12   :  { %55 = vrot.lane.b32.xlu0 %v109_v9, %s139_s7  ;;  %61 = vrot.lane.b32.xlu1 %v110_v10, %s140_s8 }
  0x16   :  { %67 = vrot.lane.b32.xlu0 %v111_v11, %s141_s13  ;;  %73 = vrot.lane.b32.xlu1 %v112_v12, %s142_s14 }
  0x1a   :  { %79 = vrot.lane.b32.xlu0 %v113_v13, %s143_s19  ;;  %85 = vrot.lane.b32.xlu1 %v114_v14, %s144_s20 }
  0x1e   :  { %91 = vrot.lane.b32.xlu0 %v115_v15, %s145_s0 }
  0x74   :  { %v8_v16 = vpop.permute.xlu0 %7   ;;  %v20_v17 = vpop.permute.xlu1 %19  }
  0x75   :  { %10 = vst.msk [vmem:[#allocation0] sm:$0x1] %vm9_vm1, %v8_v16  }
  0x78   :  { %v14_v18 = vpop.permute.xlu0 %13   ;;  %v26_v19 = vpop.permute.xlu1 %25  }
  0x79   :  { %16 = vst.msk [vmem:[#allocation0] sm:$0x1] %vm15_vm2, %v14_v18  }
  0x7a   :  { %22 = vst.msk [vmem:[#allocation0] sm:$0x1] %vm21_vm3, %v20_v17  }
  0x7b   :  { %28 = vst.msk [vmem:[#allocation0] sm:$0x1] %vm27_vm4, %v26_v19  }
  0x7c   :  { %v32_v20 = vpop.permute.xlu0 %31   ;;  %v38_v21 = vpop.permute.xlu1 %37  }
  0x7d   :  { %34 = vst.msk [vmem:[#allocation0] sm:$0x1] %vm33_vm5, %v32_v20  }
  0x7e   :  { %40 = vst.msk [vmem:[#allocation0] sm:$0x1] %vm39_vm6, %v38_v21  }
  0x80   :  { %v44_v22 = vpop.permute.xlu0 %43   ;;  %v50_v23 = vpop.permute.xlu1 %49  }
  0x81   :  { %46 = vst.msk [vmem:[#allocation0] sm:$0x1] %vm45_vm7, %v44_v22  }
  0x82   :  { %52 = vst.msk [vmem:[#allocation0] sm:$0x1] %vm51_vm8, %v50_v23  }
  0x84   :  { %v56_v24 = vpop.permute.xlu0 %55   ;;  %v62_v25 = vpop.permute.xlu1 %61  }
  0x85   :  { %58 = vst.msk [vmem:[#allocation0] sm:$0x1] %vm57_vm9, %v56_v24  }
  0x86   :  { %64 = vst.msk [vmem:[#allocation0] sm:$0x1] %vm63_vm10, %v62_v25  }
  0x88   :  { %v68_v26 = vpop.permute.xlu0 %67   ;;  %v74_v27 = vpop.permute.xlu1 %73  }
  0x89   :  { %70 = vst.msk [vmem:[#allocation0] sm:$0x1] %vm69_vm11, %v68_v26  }
  0x8a   :  { %76 = vst.msk [vmem:[#allocation0] sm:$0x1] %vm75_vm12, %v74_v27  }
  0x8c   :  { %v80_v28 = vpop.permute.xlu0 %79   ;;  %v86_v29 = vpop.permute.xlu1 %85  }
  0x8d   :  { %82 = vst.msk [vmem:[#allocation0] sm:$0x1] %vm81_vm13, %v80_v28  }
  0x8e   :  { %88 = vst.msk [vmem:[#allocation0] sm:$0x1] %vm87_vm14, %v86_v29  }
  0x90   :  { %v92_v30 = vpop.permute.xlu0 %91  }
  0x91   :  { %94 = vst.msk [vmem:[#allocation0] sm:$0x1] %vm93_vm15, %v92_v30  }
  0x98   :  { %v98_v31 = vld [vmem:[#allocation0] sm:$0x1] }
  0x99   :  { %100 = vst [vmem:[%s208_s1] sm:$0x1] %v98_v31 }

// kernel: conv_bn_layer.3
= control target key start
LH: loop header
LB: loop body
LE: loop exit
PB: predicated region body
PF: predicated region fallthrough
CT: control target
= control target key end

     0   :  { %s309_s12 = smov 0   ;;  %s332_s0 = inlined_call_operand.vmem [shape: f32[2,16,128], index: 0, kind: input, shape index: {}, may-alias: {0,3}]   ;;  %s333_s1 = inlined_call_operand.vmem [shape: f32[1,128], index: 1, kind: input, shape index: {}]   ;;  %s334_s2 = inlined_call_operand.vmem [shape: f32[1,128], index: 2, kind: input, shape index: {}]   ;;  %s335_s3 = inlined_call_operand.vmem [shape: f32[2,16,128], index: 3, kind: output, shape index: {}, may-alias: {0,3}]  }
   0x1 LB: > { %s258_s13 = sadd.s32 4294967295, %s287_s12   ;;  %p262_p0 = scmp.ge.s32.totalorder %s287_s12, 1  ;;  %s287_s12 = sphi %s309_s12, %s13_s12  }
   0x2   : > { %p137_p1 = scmp.lt.s32.totalorder %s287_s12, 3 }
   0x4   : > { %p138_p2 = pnand %p262_p0, %p137_p1 }
   0x5   : > { %p161_p3 = scmp.lt.s32.totalorder (!%p138_p2), %s258_s13, 1  ;;  %v267_v0 = vld [vmem:[%s333_s1] ss:$0 sm:$0xff] (!%p138_p2) }
   0x6   : > { %141 = sbr.rel (%p138_p2) target bundleno = 32 (0x20), region = 32  ;;  %v268_v3 = vld [vmem:[%s334_s2] ss:$0 sm:$0xff] (!%p138_p2) }
   0xd   : > { %s337_s13 = smov (!%p161_p3, %s258_s13), 1 }
   0xe   : > { %s271_s14 = sshll.u32 %s337_s13, 4 }
   0xf   : > { %s165_s19 = scalar_lea.vmem %s332_s0, %s271_s14  ;;  %s170_s24 = scalar_lea.vmem %s335_s3, %s271_s14 }
  0x10   : > { %v171_v1 = vld [vmem:[%s165_s19] sm:$0xff]  ;;  %v172_v2 = vld [vmem:[%s165_s19 + $0x8] sm:$0xff] }
  0x11   : > { %v181_v4 = vmul.f32 %v267_v0, %v171_v1  ;;  %v182_v5 = vmul.f32 %v267_v0, %v172_v2 }
  0x13   : > { %v189_v6 = vadd.f32 %v268_v3, %v181_v4  ;;  %v190_v7 = vadd.f32 %v268_v3, %v182_v5 }
  0x15   : > { %v191_v8 = vadd.f32 3.0, %v189_v6  ;;  %v192_v9 = vadd.f32 3.0, %v190_v7 }
  0x17   : > { %v193_v10 = vmax.f32 %v191_v8, 0.0  ;;  %v194_v11 = vmax.f32 %v192_v9, 0.0 }
  0x19   : > { %v195_v12 = vmin.f32 %v193_v10, 6.0  ;;  %v196_v13 = vmin.f32 %v194_v11, 6.0 }
  0x1b   : > { %v197_v14 = vmul.f32 %v195_v12, %v189_v6  ;;  %v198_v15 = vmul.f32 %v196_v13, %v190_v7 }
  0x1d   : > { %v199_v16 = vmul.f32 0.16666667, %v197_v14  ;;  %v200_v17 = vmul.f32 0.16666667, %v198_v15 }
  0x1f   : > { %201 = vst [vmem:[%s170_s24] sm:$0xff] %v199_v16  ;;  %202 = vst [vmem:[%s170_s24 + $0x8] sm:$0xff] %v200_v17 }
  0x20 PF: > { %s13_s12 = sadd.s32 1, %s287_s12  }
  0x21   : > { %p10_p4 = scmp.ge.s32.totalorder %s13_s12, 4  }
  0x23   :  { %12 = sbr.rel (!%p10_p4) target bundleno = 1 (0x1), region = 62 }

// kernel: conv_bn_layer.2
= control target key start
LH: loop header
LB: loop body
LE: loop exit
PB: predicated region body
PF: predicated region fallthrough
CT: control target
= control target key end

     0   :  { %s846_s15 = smov 0   ;;  %s970_s0 = inlined_call_operand.vmem [shape: f32[2,18,72], index: 0, kind: input, shape index: {}]   ;;  %s971_s1 = inlined_call_operand.vmem [shape: f32[3,72,128], index: 1, kind: input, shape index: {}]   ;;  %s972_s2 = inlined_call_operand.vmem [shape: f32[2,16,128], index: 2, kind: output, shape index: {0}]   ;;  %s973_s3 = inlined_call_operand.vmem [shape: f32[2,1,128], index: 3, kind: output, shape index: {1}]   ;;  %s974_s4 = inlined_call_operand.vmem [shape: f32[2,1,128], index: 4, kind: output, shape index: {2}]  }
   0x1 LB: > { %s621_s16 = sadd.s32 4294967295, %s819_s15   ;;  %p625_p0 = scmp.ge.s32.totalorder %s819_s15, 1  ;;  %s819_s15 = sphi %s846_s15, %s15_s15  }
   0x2   : > { %p167_p1 = scmp.lt.s32.totalorder %s819_s15, 3 }
   0x4   : > { %p168_p2 = pnand %p625_p0, %p167_p1 }
   0x5   : > { %v217_v0 = vld [vmem:[%s971_s1] sm:$0xff] (!%p168_p2)  ;;  %v218_v1 = vld [vmem:[%s971_s1 + $0x8] sm:$0xff] (!%p168_p2)  ;;  %v219_v2 = vld [vmem:[%s971_s1 + $0x10] sm:$0xff] (!%p168_p2)  ;;  %p199_p3 = scmp.lt.s32.totalorder (!%p168_p2), %s621_s16, 1  ;;  %vm238_vm0 = vcmask (!%p168_p2), 588800  }
   0x6   : > { %171 = sbr.rel (%p168_p2) target bundleno = 276 (0x114), region = 28  ;;  %v768_v3 = vpack.c.bf16 (!%p168_p2), %v218_v1, %v217_v0  ;;  %v220_v4 = vld [vmem:[%s971_s1 + $0x18] sm:$0xff] (!%p168_p2)  ;;  %v221_v6 = vld [vmem:[%s971_s1 + $0x20] sm:$0xff] (!%p168_p2)  ;;  %v222_v7 = vld [vmem:[%s971_s1 + $0x28] sm:$0xff] (!%p168_p2) }
   0x7   : > { %v772_v5 = vpack.c.bf16 (!%p168_p2), %v220_v4, %v219_v2  ;;  %v629_v8 = vld [vmem:[%s971_s1 + $0x48] sm:$0xff] (!%p168_p2)  ;;  %v630_v9 = vld [vmem:[%s971_s1 + $0x50] sm:$0xff] (!%p168_p2)  ;;  %v631_v11 = vld [vmem:[%s971_s1 + $0x58] sm:$0xff] (!%p168_p2)  ;;  %v776_v13 = vpack.c.bf16 (!%p168_p2), %v222_v7, %v221_v6 }
   0x8   : > { %769 = vmatprep.subr.bf16.mxu0 (!%p168_p2), %v768_v3  ;;  %v752_v10 = vpack.c.bf16 (!%p168_p2), %v630_v9, %v629_v8  ;;  %v632_v12 = vld [vmem:[%s971_s1 + $0x60] sm:$0xff] (!%p168_p2)  ;;  %v633_v15 = vld [vmem:[%s971_s1 + $0x68] sm:$0xff] (!%p168_p2)  ;;  %v223_v16 = vld [vmem:[%s971_s1 + $0x30] sm:$0xff] (!%p168_p2) }
   0x9   : > { %771 = vmatpush3.bf16.msra.mxu0 (!%p168_p2), %v768_v3  ;;  %v756_v14 = vpack.c.bf16 (!%p168_p2), %v632_v12, %v631_v11  ;;  %v224_v17 = vld [vmem:[%s971_s1 + $0x38] sm:$0xff] (!%p168_p2)  ;;  %v634_v18 = vld [vmem:[%s971_s1 + $0x70] sm:$0xff] (!%p168_p2)  ;;  %v636_v23 = vld [vmem:[%s971_s1 + $0x80] sm:$0xff] (!%p168_p2) }
   0xa   : > { %773 = vmatprep.subr.bf16.mxu0 (!%p168_p2), %v772_v5  ;;  %753 = vmatprep.subr.bf16.mxu1 (!%p168_p2), %v752_v10  ;;  %v760_v20 = vpack.c.bf16 (!%p168_p2), %v634_v18, %v633_v15  ;;  %v780_v21 = vpack.c.bf16 (!%p168_p2), %v224_v17, %v223_v16  ;;  %v635_v22 = vld [vmem:[%s971_s1 + $0x78] sm:$0xff] (!%p168_p2)  ;;  %v225_v26 = vld [vmem:[%s971_s1 + $0x40] sm:$0xff] (!%p168_p2)  ;;  %v642_v27 = vld [vmem:[%s971_s1 + $0x90] sm:$0xff] (!%p168_p2) }
   0xb   : > { %755 = vmatpush3.bf16.msra.mxu1 (!%p168_p2), %v752_v10  ;;  %v764_v25 = vpack.c.bf16 (!%p168_p2), %v636_v23, %v635_v22  ;;  %v643_v28 = vld [vmem:[%s971_s1 + $0x98] sm:$0xff] (!%p168_p2)  ;;  %v644_v29 = vld [vmem:[%s971_s1 + $0xa0] sm:$0xff] (!%p168_p2)  ;;  %v645_v30 = vld [vmem:[%s971_s1 + $0xa8] sm:$0xff] (!%p168_p2) }
   0xc   : > { %757 = vmatprep.subr.bf16.mxu1 (!%p168_p2), %v756_v14  ;;  %v784_v31 = vpack.c.bf16 (!%p168_p2), %v643_v28, %v642_v27  ;;  %v637_v32 = vld [vmem:[%s971_s1 + $0x88] sm:$0xff] (!%p168_p2)  ;;  %v788_v34 = vpack.c.bf16 (!%p168_p2), %v645_v30, %v644_v29  ;;  %v646_v36 = vld [vmem:[%s971_s1 + $0xb0] sm:$0xff] (!%p168_p2)  ;;  %v647_v37 = vld [vmem:[%s971_s1 + $0xb8] sm:$0xff] (!%p168_p2) }
   0xd   : > { %s976_s16 = smov (!%p199_p3, %s621_s16), 1  ;;  %775 = vmatpush3.bf16.msra.mxu0 %v772_v5  ;;  %v792_v39 = vpack.c.bf16 %v647_v37, %v646_v36  ;;  %v648_v40 = vld [vmem:[%s971_s1 + $0xc0] sm:$0xff]  ;;  %v649_v41 = vld [vmem:[%s971_s1 + $0xc8] sm:$0xff]  ;;  %v650_v43 = vld [vmem:[%s971_s1 + $0xd0] sm:$0xff] }
   0xe   : > { %s804_s7 = smul.u32 24, %s976_s16  ;;  %777 = vmatprep.subr.bf16.mxu0 %v776_v13  ;;  %v796_v42 = vpack.c.bf16 %v649_v41, %v648_v40  ;;  %s655_s28 = sshll.u32 %s976_s16, 4 }
   0xf   : > { %759 = vmatpush3.bf16.msra.mxu1 %v756_v14  ;;  %s208_s5 = scalar_lea.vmem %s972_s2, %s655_s28  ;;  %s214_s10 = scalar_lea.vmem %s974_s4, %s976_s16 }
  0x10   : > { %s899_s22 = scalar_lea.vmem %s970_s0, %s804_s7  ;;  %761 = vmatprep.subr.bf16.mxu1 %v760_v20  ;;  %s211_s7 = scalar_lea.vmem %s973_s3, %s976_s16 }
  0x11   : > { %v215_v19 = vld [vmem:[%s899_s22] sm:$0xff]  ;;  %779 = vmatpush3.bf16.msra.mxu0 %v776_v13  ;;  %v216_v33 = vld [vmem:[%s899_s22 + $0x8] sm:$0xff] }
  0x12   : > { %728 = vmatprep.mubr.msk.f32.mxu0 %vm238_vm0, %v215_v19  ;;  %v226_v24 = vld [vmem:[%s899_s22 + $0x1] sm:$0xff]  ;;  %781 = vmatprep.subr.bf16.mxu0 %v780_v21  ;;  %v227_v38 = vld [vmem:[%s899_s22 + $0x9] sm:$0xff] }
  0x13   : > { %707 = vmatprep.mubr.msk.f32.mxu1 %vm238_vm0, %v226_v24  ;;  %763 = vmatpush3.bf16.msra.mxu1 %v760_v20  ;;  %v401_v35 = vld [vmem:[%s899_s22 + $0x2] sm:$0xff]  ;;  %v402_v44 = vld [vmem:[%s899_s22 + $0xa] sm:$0xff] }
  0x14   : > { %765 = vmatprep.subr.bf16.mxu1 %v764_v25 }
  0x15   : > { %783 = vmatpush3.bf16.msra.mxu0 %v780_v21 }
  0x16   : > { %726 = vmatprep.subr.mxu0 %v225_v26 }
  0x17   : > { %767 = vmatpush3.bf16.msra.mxu1 %v764_v25 }
  0x18   : > { %705 = vmatprep.subr.mxu1 %v637_v32 }
  0x19   : > { %727 = vmatpush3.msra.mxu0 %v225_v26 }
  0x1a   : > { %785 = vmatprep.subr.bf16.mxu0 %v784_v31  ;;  %729 = vmatmul.mubr.msk.f32.vlgmr.msra.gmra.mrb[0].mxu0 %vm238_vm0, %v216_v33 }
  0x1b   : > { %787 = vmatpush3.bf16.msra.mxu0 %v784_v31  ;;  %749 = vmatprep.mubr.msk.f32.mxu0 %vm238_vm0, %v401_v35 }
  0x1c   : > { %789 = vmatprep.subr.bf16.mxu0 %v788_v34  ;;  %706 = vmatpush3.msra.mxu1 %v637_v32 }
  0x1d   : > { %708 = vmatmul.mubr.msk.f32.vlgmr.msra.gmra.mrb[0].mxu1 %vm238_vm0, %v227_v38 }
  0x1f   : > { %791 = vmatpush3.bf16.msra.mxu0 %v788_v34 }
  0x20   : > { %793 = vmatprep.subr.bf16.mxu0 %v792_v39 }
  0x23   : > { %795 = vmatpush3.bf16.msra.mxu0 %v792_v39 }
  0x24   : > { %797 = vmatprep.subr.bf16.mxu0 %v796_v42 }
  0x27   : > { %799 = vmatpush3.bf16.msra.mxu0 %v796_v42 }
  0x28   : > { %747 = vmatprep.subr.mxu0 %v650_v43 }
  0x2b   : > { %748 = vmatpush3.msra.mxu0 %v650_v43 }
  0x2c   : > { %750 = vmatmul.mubr.msk.f32.vlgmr.msra.gmra.mrb[0].mxu0 %vm238_vm0, %v402_v44 }
  0xf0   : > { %v709_v45 = vpop.f32.mrb[0].mxu1 }
  0xf1   : > { %v311_v46 = vpop.f32.mrb[1].mxu1 }
  0xff   : > { %v751_v47 = vpop.f32.mrb[0].mxu0 }
 0x100   : > { %v800_v48 = vadd.f32 %v751_v47, %v709_v45  ;;  %v485_v49 = vpop.f32.mrb[1].mxu0 }
 0x101   : > { %v801_v50 = vadd.f32 %v485_v49, %v311_v46 }
 0x102   : > { %497 = vst [vmem:[%s208_s5 + $0x8] sm:$0xff] %v800_v48  ;;  %v507_v51 = vmul.f32 %v800_v48, %v800_v48 }
 0x103   : > { %496 = vst [vmem:[%s208_s5] sm:$0xff] %v801_v50  ;;  %v498_v52 = vadd.f32 %v801_v50, %v800_v48  ;;  %v506_v53 = vmul.f32 %v801_v50, %v801_v50 }
 0x105   : > { %v499_v54 = vrot.slane %v498_v52, 4  ;;  %v508_v55 = vadd.f32 %v507_v51, %v506_v53 }
 0x107   : > { %v500_v56 = vadd.f32 %v499_v54, %v498_v52  ;;  %v509_v57 = vrot.slane %v508_v55, 4 }
 0x109   : > { %v501_v58 = vrot.slane %v500_v56, 2  ;;  %v510_v59 = vadd.f32 %v509_v57, %v508_v55 }
 0x10b   : > { %v502_v60 = vadd.f32 %v501_v58, %v500_v56  ;;  %v511_v61 = vrot.slane %v510_v59, 2 }
 0x10d   : > { %v503_v62 = vrot.slane %v502_v60, 1  ;;  %v512_v63 = vadd.f32 %v511_v61, %v510_v59 }
 0x10f   : > { %v504_v0 = vadd.f32 %v503_v62, %v502_v60  ;;  %v513_v1 = vrot.slane %v512_v63, 1 }
 0x111   : > { %505 = vst [vmem:[%s211_s7] sm:$0x1] %v504_v0  ;;  %v514_v2 = vadd.f32 %v513_v1, %v512_v63 }
 0x113   : > { %515 = vst [vmem:[%s214_s10] sm:$0x1] %v514_v2 }
 0x114 PF: > { %s15_s15 = sadd.s32 1, %s819_s15  }
 0x115   : > { %p12_p4 = scmp.ge.s32.totalorder %s15_s15, 4  }
 0x117   :  { %14 = sbr.rel (!%p12_p4) target bundleno = 1 (0x1), region = 84 }

</bundles_post_ra>
